<compile_context>
chip_gen: v5e
topology: v5e:2x2
jax: 0.10.0
libtpu: 0.0.40
codegen_flags: <defaults>
</compile_context>

<pallas_src>
import jax
import jax.numpy as jnp
from jax.experimental import pallas as pl
from jax.experimental.pallas import tpu as pltpu


def _round_up(v, m):
    return ((v + m - 1) // m) * m


def ffn_kernel(x_ref, w1_ref, b1_ref, w2_ref, b2_ref, o_ref, acc_ref):
    # x_ref:  (TM, IDIM_P)  f32  current row-tile of the flattened input
    # w1_ref: (IDIM_P, TH)  bf16 hid-chunk of first-layer weight
    # b1_ref: (1, TH)       f32
    # w2_ref: (TH, IDIM_P)  bf16 hid-chunk of second-layer weight
    # b2_ref: (1, IDIM_P)   f32
    # acc_ref:(TM, IDIM_P)  f32  VMEM accumulator (resident across hid chunks)
    k = pl.program_id(1)

    @pl.when(k == 0)
    def _init():
        acc_ref[...] = jnp.zeros_like(acc_ref)

    x = x_ref[...].astype(jnp.bfloat16)
    h = jnp.dot(x, w1_ref[...], preferred_element_type=jnp.float32)
    h = jnp.maximum(h + b1_ref[...], 0.0)            # bias + ReLU in f32
    # dropout: identity at inference
    acc_ref[...] += jnp.dot(h.astype(jnp.bfloat16), w2_ref[...],
                            preferred_element_type=jnp.float32)

    @pl.when(k == pl.num_programs(1) - 1)
    def _finalize():
        o_ref[...] = (acc_ref[...] + b2_ref[...]).astype(o_ref.dtype)


def positionwise_feed_forward(x, w1, b1, w2, b2, *, tile_m=256, tile_h=512):
    """x: (batch, seq, idim) f32. w1: (idim, hid), w2: (hid, idim) (= W^T of torch)."""
    batch, seq, idim = x.shape
    hid = w1.shape[1]
    M = batch * seq

    # Lane-align feature dims; clamp / align tiles.
    idim_p = _round_up(idim, 128)
    hid_p = _round_up(hid, 128)
    tile_h = min(tile_h, hid_p)
    hid_p = _round_up(hid_p, tile_h)
    tile_m = min(tile_m, _round_up(M, 8))
    M_p = _round_up(M, tile_m)

    x2d = jnp.pad(x.reshape(M, idim), ((0, M_p - M), (0, idim_p - idim)))
    w1_p = jnp.pad(w1, ((0, idim_p - idim), (0, hid_p - hid))).astype(jnp.bfloat16)
    b1_p = jnp.pad(b1, (0, hid_p - hid)).reshape(1, hid_p).astype(jnp.float32)
    w2_p = jnp.pad(w2, ((0, hid_p - hid), (0, idim_p - idim))).astype(jnp.bfloat16)
    b2_p = jnp.pad(b2, (0, idim_p - idim)).reshape(1, idim_p).astype(jnp.float32)

    grid = (M_p // tile_m, hid_p // tile_h)

    cost = pl.CostEstimate(
        flops=4 * M_p * idim_p * hid_p,          # two matmuls
        transcendentals=0,
        bytes_accessed=(x2d.size * 4 + M_p * idim_p * 4
                        + w1_p.size * 2 + w2_p.size * 2
                        + b1_p.size * 4 + b2_p.size * 4),
    )

    out2d = pl.pallas_call(
        ffn_kernel,
        out_shape=jax.ShapeDtypeStruct((M_p, idim_p), x.dtype),
        grid_spec=pltpu.PrefetchScalarGridSpec(
            num_scalar_prefetch=0,
            grid=grid,
            in_specs=[
                pl.BlockSpec((tile_m, idim_p), lambda i, k: (i, 0)),   # x tile
                pl.BlockSpec((idim_p, tile_h), lambda i, k: (0, k)),   # w1 chunk
                pl.BlockSpec((1, tile_h), lambda i, k: (0, k)),        # b1 chunk
                pl.BlockSpec((tile_h, idim_p), lambda i, k: (k, 0)),   # w2 chunk
                pl.BlockSpec((1, idim_p), lambda i, k: (0, 0)),        # b2
            ],
            out_specs=pl.BlockSpec((tile_m, idim_p), lambda i, k: (i, 0)),
            scratch_shapes=[pltpu.VMEM((tile_m, idim_p), jnp.float32)],
        ),
        compiler_params=pltpu.CompilerParams(
            dimension_semantics=("parallel", "arbitrary")),
        cost_estimate=cost,
    )(x2d, w1_p, b1_p, w2_p, b2_p)

    return out2d[:M, :idim].reshape(batch, seq, idim)


def _ref_bf16(x, w1, b1, w2, b2):
    """Plain-JAX reference mirroring the kernel's numerics (bf16 MXU, f32 acc)."""
    b, s, idim = x.shape
    x2d = x.reshape(b * s, idim).astype(jnp.bfloat16)
    h = jnp.dot(x2d, w1.astype(jnp.bfloat16),
                preferred_element_type=jnp.float32) + b1
    h = jnp.maximum(h, 0.0)
    y = jnp.dot(h.astype(jnp.bfloat16), w2.astype(jnp.bfloat16),
                preferred_element_type=jnp.float32) + b2
    return y.reshape(b, s, -1)


if __name__ == "__main__":
    key = jax.random.PRNGKey(0)

    # ---- Test 1: small shapes consistent with the module ----
    batch, seq = 2, 8
    idim, hidden_units = 32, 64
    kx, k1, kb1, k2, kb2, key = jax.random.split(key, 6)
    x = jax.random.normal(kx, (batch, seq, idim), dtype=jnp.float32)
    w1 = jax.random.normal(k1, (idim, hidden_units), dtype=jnp.float32) * 0.05
    b1 = jax.random.normal(kb1, (hidden_units,), dtype=jnp.float32) * 0.01
    w2 = jax.random.normal(k2, (hidden_units, idim), dtype=jnp.float32) * 0.05
    b2 = jax.random.normal(kb2, (idim,), dtype=jnp.float32) * 0.01

    out = positionwise_feed_forward(x, w1, b1, w2, b2)
    jax.block_until_ready(out)
    assert out.shape == (batch, seq, idim)
    ref_b = _ref_bf16(x, w1, b1, w2, b2)
    ref_f = jnp.maximum(x @ w1 + b1, 0.0) @ w2 + b2
    assert jnp.allclose(out, ref_b, atol=2e-3, rtol=2e-3)
    assert jnp.allclose(out, ref_f, atol=3e-2, rtol=3e-2)

    # ---- Test 2: exercises hid-dim chunking + non-divisible M padding ----
    batch2, seq2 = 2, 37
    idim2, hid2 = 256, 1000
    kx, k1, kb1, k2, kb2, key = jax.random.split(key, 6)
    x2 = jax.random.normal(kx, (batch2, seq2, idim2), dtype=jnp.float32)
    w1b = jax.random.normal(k1, (idim2, hid2), dtype=jnp.float32) * 0.05
    b1b = jax.random.normal(kb1, (hid2,), dtype=jnp.float32) * 0.01
    w2b = jax.random.normal(k2, (hid2, idim2), dtype=jnp.float32) * 0.05
    b2b = jax.random.normal(kb2, (idim2,), dtype=jnp.float32) * 0.01

    out2 = positionwise_feed_forward(x2, w1b, b1b, w2b, b2b)
    jax.block_until_ready(out2)
    assert out2.shape == (batch2, seq2, idim2)
    ref2 = _ref_bf16(x2, w1b, b1b, w2b, b2b)
    assert jnp.allclose(out2, ref2, atol=2e-3, rtol=2e-3)

    print("KERNEL_OK")
</pallas_src>

<mosaic_0001>
module attributes {stable_mosaic.version = 11 : i64} {
  func.func @ffn_kernel(%arg0: i32, %arg1: i32, %arg2: memref<16x128xf32, #tpu.memory_space<vmem>>, %arg3: memref<128x128xbf16, #tpu.memory_space<vmem>>, %arg4: memref<1x128xf32, #tpu.memory_space<vmem>>, %arg5: memref<128x128xbf16, #tpu.memory_space<vmem>>, %arg6: memref<1x128xf32, #tpu.memory_space<vmem>>, %arg7: memref<16x128xf32, #tpu.memory_space<vmem>>, %arg8: memref<16x128xf32, #tpu.memory_space<vmem>>) attributes {dimension_semantics = [#tpu.dimension_semantics<parallel>, #tpu.dimension_semantics<arbitrary>], iteration_bounds = array<i64: 1, 1>, scalar_prefetch = 0 : i64, scratch_operands = 1 : i64, tpu.core_type = #tpu.core_type<tc>, window_params = [{transform_indices = @transform_0, window_bounds = array<i64: 16, 128>}, {transform_indices = @transform_1, window_bounds = array<i64: 128, 128>}, {transform_indices = @transform_2, window_bounds = array<i64: 1, 128>}, {transform_indices = @transform_3, window_bounds = array<i64: 128, 128>}, {pipeline_mode = #tpu.pipeline_mode<synchronous>, transform_indices = @transform_4, window_bounds = array<i64: 1, 128>}, {transform_indices = @transform_5, window_bounds = array<i64: 16, 128>}]} {
    %c0_i32 = arith.constant 0 : i32
    %0 = arith.cmpi eq, %arg1, %c0_i32 : i32
    %1 = arith.extui %0 : i1 to i32
    %c0_i32_0 = arith.constant 0 : i32
    %2 = arith.cmpi ne, %1, %c0_i32_0 : i32
    scf.if %2 {
      %cst_16 = arith.constant 0.000000e+00 : f32
      %21 = vector.broadcast %cst_16 : f32 to vector<16x128xf32>
      %c0_17 = arith.constant 0 : index
      %c0_18 = arith.constant 0 : index
      %22 = vector.load %arg8[%c0_17, %c0_18] : memref<16x128xf32, #tpu.memory_space<vmem>>, vector<16x128xf32>
      tpu.vector_store %arg8[%c0_17, %c0_18], %21 {strides = array<i32>} : memref<16x128xf32, #tpu.memory_space<vmem>>, vector<16x128xf32>,
    } else {
    }
    %c0 = arith.constant 0 : index
    %c0_1 = arith.constant 0 : index
    %3 = vector.load %arg2[%c0, %c0_1] : memref<16x128xf32, #tpu.memory_space<vmem>>, vector<16x128xf32>
    %4 = arith.truncf %3 : vector<16x128xf32> to vector<16x128xbf16>
    %c0_2 = arith.constant 0 : index
    %c0_3 = arith.constant 0 : index
    %5 = vector.load %arg3[%c0_2, %c0_3] : memref<128x128xbf16, #tpu.memory_space<vmem>>, vector<128x128xbf16>
    %cst = arith.constant dense<0.000000e+00> : vector<16x128xf32>
    %6 = tpu.matmul %4, %5, %cst {dimension_numbers = #tpu.dot_dimension_numbers<[1], [0], [0], [1], [0, 0, 1, 1], [], []>} : vector<16x128xbf16>, vector<128x128xbf16>, vector<16x128xf32> -> vector<16x128xf32>
    %c0_4 = arith.constant 0 : index
    %c0_5 = arith.constant 0 : index
    %7 = vector.load %arg4[%c0_4, %c0_5] : memref<1x128xf32, #tpu.memory_space<vmem>>, vector<1x128xf32>
    %8 = vector.broadcast %7 : vector<1x128xf32> to vector<16x128xf32>
    %9 = arith.addf %6, %8 : vector<16x128xf32>
    %cst_6 = arith.constant 0.000000e+00 : f32
    %10 = vector.broadcast %cst_6 : f32 to vector<16x128xf32>
    %11 = arith.maximumf %9, %10 : vector<16x128xf32>
    %c0_7 = arith.constant 0 : index
    %c0_8 = arith.constant 0 : index
    %12 = vector.load %arg8[%c0_7, %c0_8] : memref<16x128xf32, #tpu.memory_space<vmem>>, vector<16x128xf32>
    %13 = arith.truncf %11 : vector<16x128xf32> to vector<16x128xbf16>
    %c0_9 = arith.constant 0 : index
    %c0_10 = arith.constant 0 : index
    %14 = vector.load %arg5[%c0_9, %c0_10] : memref<128x128xbf16, #tpu.memory_space<vmem>>, vector<128x128xbf16>
    %cst_11 = arith.constant dense<0.000000e+00> : vector<16x128xf32>
    %15 = tpu.matmul %13, %14, %cst_11 {dimension_numbers = #tpu.dot_dimension_numbers<[1], [0], [0], [1], [0, 0, 1, 1], [], []>} : vector<16x128xbf16>, vector<128x128xbf16>, vector<16x128xf32> -> vector<16x128xf32>
    %16 = arith.addf %12, %15 : vector<16x128xf32>
    %c0_12 = arith.constant 0 : index
    %c0_13 = arith.constant 0 : index
    %17 = vector.load %arg8[%c0_12, %c0_13] : memref<16x128xf32, #tpu.memory_space<vmem>>, vector<16x128xf32>
    tpu.vector_store %arg8[%c0_12, %c0_13], %16 {strides = array<i32>} : memref<16x128xf32, #tpu.memory_space<vmem>>, vector<16x128xf32>,
    %c0_i32_14 = arith.constant 0 : i32
    %18 = arith.cmpi eq, %arg1, %c0_i32_14 : i32
    %19 = arith.extui %18 : i1 to i32
    %c0_i32_15 = arith.constant 0 : i32
    %20 = arith.cmpi ne, %19, %c0_i32_15 : i32
    scf.if %20 {
      %c0_16 = arith.constant 0 : index
      %c0_17 = arith.constant 0 : index
      %21 = vector.load %arg8[%c0_16, %c0_17] : memref<16x128xf32, #tpu.memory_space<vmem>>, vector<16x128xf32>
      %c0_18 = arith.constant 0 : index
      %c0_19 = arith.constant 0 : index
      %22 = vector.load %arg6[%c0_18, %c0_19] : memref<1x128xf32, #tpu.memory_space<vmem>>, vector<1x128xf32>
      %23 = vector.broadcast %22 : vector<1x128xf32> to vector<16x128xf32>
      %24 = arith.addf %21, %23 : vector<16x128xf32>
      %c0_20 = arith.constant 0 : index
      %c0_21 = arith.constant 0 : index
      %25 = vector.load %arg7[%c0_20, %c0_21] : memref<16x128xf32, #tpu.memory_space<vmem>>, vector<16x128xf32>
      tpu.vector_store %arg7[%c0_20, %c0_21], %24 {strides = array<i32>} : memref<16x128xf32, #tpu.memory_space<vmem>>, vector<16x128xf32>,
    } else {
    }
    return
  }
  func.func @transform_0(%arg0: i32, %arg1: i32) -> (i32, i32) {
    %c0_i32 = arith.constant 0 : i32
    %c0_i32_0 = arith.constant 0 : i32
    return %arg0, %c0_i32 : i32, i32
  }
  func.func @transform_1(%arg0: i32, %arg1: i32) -> (i32, i32) {
    %c0_i32 = arith.constant 0 : i32
    %c0_i32_0 = arith.constant 0 : i32
    return %c0_i32, %arg1 : i32, i32
  }
  func.func @transform_2(%arg0: i32, %arg1: i32) -> (i32, i32) {
    %c0_i32 = arith.constant 0 : i32
    %c0_i32_0 = arith.constant 0 : i32
    return %c0_i32, %arg1 : i32, i32
  }
  func.func @transform_3(%arg0: i32, %arg1: i32) -> (i32, i32) {
    %c0_i32 = arith.constant 0 : i32
    %c0_i32_0 = arith.constant 0 : i32
    return %arg1, %c0_i32 : i32, i32
  }
  func.func @transform_4(%arg0: i32, %arg1: i32) -> (i32, i32) {
    %c0_i32 = arith.constant 0 : i32
    %c0_i32_0 = arith.constant 0 : i32
    %c0_i32_1 = arith.constant 0 : i32
    return %c0_i32, %c0_i32_0 : i32, i32
  }
  func.func @transform_5(%arg0: i32, %arg1: i32) -> (i32, i32) {
    %c0_i32 = arith.constant 0 : i32
    %c0_i32_0 = arith.constant 0 : i32
    return %arg0, %c0_i32 : i32, i32
  }
}

</mosaic_0001>

<bundles_post_ra>
// kernel: tpu_custom_call.1
= control target key start
LH: loop header
LB: loop body
LE: loop exit
PB: predicated region body
PF: predicated region fallthrough
CT: control target
= control target key end

     0   :  { %10 = vsyncpa [#allocation4], 0  ;;  %s533_s0 = inlined_call_operand.hbm [shape: f32[16,128], index: 0, kind: input, shape index: {}]   ;;  %s534_s1 = inlined_call_operand.hbm [shape: bf16[128,128], index: 1, kind: input, shape index: {}]   ;;  %s535_s2 = inlined_call_operand.vmem [shape: f32[1,128], index: 2, kind: input, shape index: {}]   ;;  %s536_s3 = inlined_call_operand.hbm [shape: bf16[128,128], index: 3, kind: input, shape index: {}]   ;;  %s537_s4 = inlined_call_operand.vmem [shape: f32[1,128], index: 4, kind: input, shape index: {}]   ;;  %s538_s5 = inlined_call_operand.hbm [shape: f32[16,128], index: 5, kind: output, shape index: {}]  }
   0x1   :  { %11 = vsyncpa [#allocation7], 0  ;;  %s30_s20 = sshll.u32 %s534_s1, 4  ;;  %s31_s20 = int_to_ptr.hbm [resolvable:$true] %s30_s20 }
   0x2   :  { %12 = vsyncpa [#allocation5], 0  ;;  %s471_s21 = smov [#allocation6]   ;;  %s17_s25 = sshll.u32 %s533_s0, 4  ;;  %s18_s25 = int_to_ptr.hbm [resolvable:$true] %s17_s25 }
   0x3   :  { %s32_s22 = sshll.u32 %s471_s21, 4  ;;  %s472_s26 = smov 64   ;;  %s33_s22 = int_to_ptr.vmem [resolvable:$true] %s32_s22 }
   0x4   :  { %s473_s27 = smov 4   ;;  %s474_s28 = smov [#allocation3]  }
   0x5   :  { %38 = dma.hbm_to_vmem [thread:$0]  %s31_s20, 1024, %s33_s22, [#allocation7], %s472_s26, %s472_s26, %s473_s27  }
   0x6   :  { %s19_s29 = sshll.u32 %s474_s28, 4  ;;  %s475_s30 = smov 128   ;;  %s20_s29 = int_to_ptr.vmem [resolvable:$true] %s19_s29 }
   0x7   :  { %s476_s6 = smov 8   ;;  %s45_s8 = sshll.u32 %s536_s3, 4  ;;  %s46_s8 = int_to_ptr.hbm [resolvable:$true] %s45_s8 }
   0x8   :  { %25 = dma.hbm_to_vmem [thread:$0]  %s18_s25, 256, %s20_s29, [#allocation4], %s475_s30, %s475_s30, %s476_s6  }
   0x9   :  { %s477_s9 = smov [#allocation8]  }
   0xa   :  { %s47_s0 = sshll.u32 %s477_s9, 4  ;;  %s48_s0 = int_to_ptr.vmem [resolvable:$true] %s47_s0 }
   0xb   :  { %53 = dma.hbm_to_vmem [thread:$0]  %s46_s8, 1024, %s48_s0, [#allocation7], %s472_s26, %s472_s26, %s473_s27  }
   0xc   :  { %465 = dma.done.wait [#allocation4], 256  }
   0xd   :  { %466 = vsyncadd [#allocation4], 4294967040 }
   0xe   :  { %467 = dma.done.wait [#allocation7], 2048  }
   0xf   :  { %468 = vsyncadd [#allocation7], 4294965248  ;;  %v350_v0 = vld [vmem:[#allocation6 + $0x38] sm:$0xff]  ;;  %v349_v1 = vld [vmem:[#allocation6 + $0x30] sm:$0xff]  ;;  %s478_s13 = smov [#allocation9]  }
  0x10   :  { %145 = vmatpush.bf16.msra.mxu0 %v350_v0  ;;  %v358_v2 = vld [vmem:[#allocation8 + $0x38] sm:$0xff]  ;;  %v357_v3 = vld [vmem:[#allocation8 + $0x30] sm:$0xff]  ;;  %v348_v4 = vld [vmem:[#allocation6 + $0x28] sm:$0xff]  ;;  %s263_s14 = sshll.u32 %s478_s13, 4  ;;  %s264_s14 = int_to_ptr.vmem [resolvable:$true] %s263_s14 }
  0x11   :  { %228 = vmatpush.bf16.msra.mxu1 %v358_v2  ;;  %v356_v5 = vld [vmem:[#allocation8 + $0x28] sm:$0xff]  ;;  %v347_v6 = vld [vmem:[#allocation6 + $0x20] sm:$0xff]  ;;  %v346_v8 = vld [vmem:[#allocation6 + $0x18] sm:$0xff] }
  0x12   :  { %v355_v7 = vld [vmem:[#allocation8 + $0x20] sm:$0xff]  ;;  %v345_v9 = vld [vmem:[#allocation6 + $0x10] sm:$0xff]  ;;  %v344_v10 = vld [vmem:[#allocation6 + $0x8] sm:$0xff] }
  0x13   :  { %v343_v11 = vld [vmem:[#allocation6] sm:$0xff]  ;;  %v74_v12 = vld [vmem:[#allocation3] sm:$0xff]  ;;  %v75_v13 = vld [vmem:[#allocation3 + $0x8] sm:$0xff] }
  0x14   :  { %146 = vmatpush.bf16.msra.mxu0 %v349_v1  ;;  %v76_v14 = vpack.c.bf16 %v75_v13, %v74_v12  ;;  %v354_v15 = vld [vmem:[#allocation8 + $0x18] sm:$0xff]  ;;  %v353_v16 = vld [vmem:[#allocation8 + $0x10] sm:$0xff]  ;;  %v352_v17 = vld [vmem:[#allocation8 + $0x8] sm:$0xff] }
  0x15   :  { %229 = vmatpush.bf16.msra.mxu1 %v357_v3  ;;  %v351_v18 = vld [vmem:[#allocation8] sm:$0xff]  ;;  %v367_v20 = vld [vmem:[%s535_s2] ss:$0 sm:$0xff]  ;;  %s265_s2 = sshll.u32 %s538_s5, 4  ;;  %s266_s2 = int_to_ptr.hbm [resolvable:$true] %s265_s2 }
  0x16   :  { %v368_v27 = vld [vmem:[%s537_s4] ss:$0 sm:$0xff] }
  0x18   :  { %147 = vmatpush.bf16.msra.mxu0 %v348_v4 }
  0x19   :  { %230 = vmatpush.bf16.msra.mxu1 %v356_v5 }
  0x1c   :  { %148 = vmatpush.bf16.msra.mxu0 %v347_v6 }
  0x1d   :  { %231 = vmatpush.bf16.msra.mxu1 %v355_v7 }
  0x20   :  { %149 = vmatpush.bf16.msra.mxu0 %v346_v8 }
  0x21   :  { %232 = vmatpush.bf16.msra.mxu1 %v354_v15 }
  0x24   :  { %150 = vmatpush.bf16.msra.mxu0 %v345_v9 }
  0x25   :  { %233 = vmatpush.bf16.msra.mxu1 %v353_v16 }
  0x28   :  { %151 = vmatpush.bf16.msra.mxu0 %v344_v10 }
  0x29   :  { %234 = vmatpush.bf16.msra.mxu1 %v352_v17 }
  0x2c   :  { %152 = vmatpush.bf16.msra.mxu0 %v343_v11 }
  0x2d   :  { %235 = vmatpush.bf16.msra.mxu1 %v351_v18 }
  0x2f   :  { %153 = vmatmul.bf16.vlgmr.msra.gmra.mxu0 %v76_v14 }
  0xac   :  { %v154_v19 = vpop.f32.mrf.mxu0 }
  0xad   :  { %v155_v21 = vadd.f32 %v367_v20, %v154_v19 }
  0xaf   :  { %v159_v24 = vmax.f32 %v155_v21, 0.0 }
  0xb4   :  { %v156_v22 = vpop.f32.mrf.mxu0 }
  0xb5   :  { %v157_v23 = vadd.f32 %v367_v20, %v156_v22 }
  0xb7   :  { %v160_v25 = vmax.f32 %v157_v23, 0.0 }
  0xb9   :  { %v163_v26 = vpack.c.bf16 %v160_v25, %v159_v24 }
  0xbb   :  { %236 = vmatmul.bf16.vlgmr.msra.gmra.mxu1 %v163_v26 }
 0x138   :  { %v237_v28 = vpop.f32.mrf.mxu1 }
 0x139   :  { %v255_v29 = vadd.f32 %v368_v27, %v237_v28 }
 0x13b   :  { %257 = vst [vmem:[#allocation9] sm:$0xff] %v255_v29 }
 0x140   :  { %v239_v30 = vpop.f32.mrf.mxu1 }
 0x141   :  { %v256_v31 = vadd.f32 %v368_v27, %v239_v30 }
 0x143   :  { %258 = vst [vmem:[#allocation9 + $0x8] sm:$0xff] %v256_v31 }
 0x144   :  { %271 = dma.vmem_to_hbm [thread:$0]  %s264_s14, 256, %s266_s2, [#allocation5], %s475_s30, %s475_s30, %s476_s6  }
 0x145   :  { %469 = dma.done.wait [#allocation5], 256  }
 0x146   :  { %470 = vsyncadd [#allocation5], 4294967040 }
 0x147   :  { %276 = vsyncpa [#allocation4], 1 }
 0x148   :  { %277 = vsyncpa [#allocation7], 1 }
 0x149   :  { %278 = vsyncpa [#allocation5], 1 }

</bundles_post_ra>
